<compile_context>
chip_gen: v7x
topology: tpu7x:2x2x1
jax: 0.10.0
libtpu: 0.0.40
codegen_flags: <defaults>
</compile_context>

<pallas_src>
import functools

import jax
import jax.numpy as jnp
from jax.experimental import pallas as pl
from jax.experimental.pallas import tpu as pltpu


# ----------------------------------------------------------------------------
# Pallas kernel: tiled fused matmul + bias + activation (the MXU hot path)
# ----------------------------------------------------------------------------
def _mm_bias_act_kernel(x_ref, w_ref, b_ref, o_ref, acc_ref, *, act):
    """acc += x_tile @ w_tile ; on the last K step: out = act(acc + bias)."""
    k = pl.program_id(2)

    @pl.when(k == 0)
    def _init():
        acc_ref[...] = jnp.zeros_like(acc_ref)

    acc_ref[...] += jnp.dot(
        x_ref[...], w_ref[...], preferred_element_type=jnp.float32
    )

    @pl.when(k == pl.num_programs(2) - 1)
    def _finalize():
        acc = acc_ref[...] + b_ref[...]          # (1, tn) f32 bias broadcast
        if act == "relu":
            acc = jnp.maximum(acc, 0.0)
        elif act == "sigmoid":
            acc = jax.nn.sigmoid(acc)
        o_ref[...] = acc.astype(o_ref.dtype)


def _pick_tile(dim, pref, align):
    """Largest tile <= pref that is a multiple of `align` and divides `dim`;
    falls back to the full dim (always legal per the (8,128)/full-dim rule)."""
    if dim % align != 0:
        return dim
    t = min(pref, dim)
    t -= t % align
    while t >= align and dim % t != 0:
        t -= align
    return t if t >= align else dim


def matmul_bias_act(x, w, b, act=None, out_dtype=jnp.float32):
    """act(x @ w + b) with x:(M,K), w:(K,N), b:(N,).

    bf16 MXU inputs / f32 VMEM accumulator / K-reduction grid axis. No padded
    HBM copies: tile sizes are aligned divisors or the full dimension."""
    M, K = x.shape
    K2, N = w.shape
    assert K == K2 and b.shape == (N,)

    # bf16 packs 16 rows per sublane group -> 16-alignment on sublane dims.
    tm = _pick_tile(M, 256, 16)
    tn = _pick_tile(N, 512, 128)
    tk = _pick_tile(K, 512, 128)
    grid = (M // tm, N // tn, K // tk)

    xb = x.astype(jnp.bfloat16)
    wb = w.astype(jnp.bfloat16)
    b2 = b.reshape(1, N).astype(jnp.float32)

    # Per-step VMEM footprint (2x double-buffered bf16 tiles + out + f32 acc)
    # stays far below the scoped default at these tile sizes, so no
    # vmem_limit_bytes override is needed.
    return pl.pallas_call(
        functools.partial(_mm_bias_act_kernel, act=act),
        grid=grid,
        in_specs=[
            pl.BlockSpec((tm, tk), lambda i, j, k: (i, k)),
            pl.BlockSpec((tk, tn), lambda i, j, k: (k, j)),
            pl.BlockSpec((1, tn), lambda i, j, k: (0, j)),
        ],
        out_specs=pl.BlockSpec((tm, tn), lambda i, j, k: (i, j)),
        out_shape=jax.ShapeDtypeStruct((M, N), out_dtype),
        scratch_shapes=[pltpu.VMEM((tm, tn), jnp.float32)],
        compiler_params=pltpu.CompilerParams(
            dimension_semantics=("parallel", "parallel", "arbitrary")
        ),
    )(xb, wb, b2)


# ----------------------------------------------------------------------------
# Conv / transposed-conv lowering (layout plumbing in JAX, matmul in Pallas)
# ----------------------------------------------------------------------------
def _im2col(x_nhwc, k, stride):
    """(B,H,W,C) -> (B*OH*OW, k*k*C) patch matrix; row order (kh, kw, c)."""
    B, H, W, C = x_nhwc.shape
    OH = (H - k) // stride + 1
    OW = (W - k) // stride + 1
    patches = []
    for kh in range(k):
        for kw in range(k):
            patches.append(
                x_nhwc[:, kh:kh + stride * OH:stride, kw:kw + stride * OW:stride, :]
            )
    cols = jnp.stack(patches, axis=3)                 # (B, OH, OW, k*k, C)
    return cols.reshape(B * OH * OW, k * k * C), (B, OH, OW)


def conv2d_s2d(x_nhwc, w_mat, b, *, pad, act, out_dtype):
    """4x4 / stride-2 conv as pad -> space-to-depth(2x2) -> 2x2 stride-1 conv
    (im2col with only 4 taps instead of 16) -> fused Pallas matmul."""
    B, H, W, C = x_nhwc.shape
    xp = jnp.pad(x_nhwc, ((0, 0), (pad, pad), (pad, pad), (0, 0)))
    Hp, Wp = H + 2 * pad, W + 2 * pad
    xs = (
        xp.reshape(B, Hp // 2, 2, Wp // 2, 2, C)
        .transpose(0, 1, 3, 2, 4, 5)
        .reshape(B, Hp // 2, Wp // 2, 4 * C)
    )
    # TODO(synk): the remaining 4-tap gather could be folded into the matmul's
    #             K grid axis (shifted-slab index_map / manual DMA) instead of
    #             materializing `cols`; kept as cheap JAX glue here.
    cols, (_, OH, OW) = _im2col(xs, k=2, stride=1)
    cout = w_mat.shape[1]
    out = matmul_bias_act(cols, w_mat, b, act=act, out_dtype=out_dtype)
    return out.reshape(B, OH, OW, cout)


def deconv2d_subpixel(x_nhwc, w_mat, b4, *, act, out_dtype):
    """4x4 / stride-2 / pad-1 ConvTranspose2d via sub-pixel decomposition:
    a single 2x2 stride-1 conv producing 4*Cout channels (one group per output
    sub-pixel (r,s)) followed by a pixel-shuffle interleave. No zero-stuffing."""
    B, H, W, Cin = x_nhwc.shape
    cout = b4.shape[0] // 4
    xp = jnp.pad(x_nhwc, ((0, 0), (1, 1), (1, 1), (0, 0)))
    cols, (_, OH, OW) = _im2col(xp, k=2, stride=1)    # OH = H+1, OW = W+1
    out = matmul_bias_act(cols, w_mat, b4, act=act, out_dtype=out_dtype)
    out = out.reshape(B, OH, OW, 2, 2, cout)
    # y[b, 2m+r, 2n+s, c] = out[b, m+r, n+s, r, s, c]
    sub = jnp.stack(
        [out[:, r:r + H, s:s + W, r, s, :] for r in range(2) for s in range(2)],
        axis=3,
    ).reshape(B, H, W, 2, 2, cout)
    return sub.transpose(0, 1, 3, 2, 4, 5).reshape(B, 2 * H, 2 * W, cout)


# ----------------------------------------------------------------------------
# Weight pre-conversion (hoisted out of the forward pass)
# ----------------------------------------------------------------------------
def _s2d_conv_weight(w_pt):
    """PyTorch Conv2d weight (Cout, Cin, 4, 4), stride 2 ->
    matmul weight (2*2*(4*Cin), Cout) matching space-to-depth im2col order."""
    cout, cin = w_pt.shape[0], w_pt.shape[1]
    w = w_pt.reshape(cout, cin, 2, 2, 2, 2)           # (co, ci, bh, rh, bw, rw)
    w = jnp.transpose(w, (2, 4, 3, 5, 1, 0))          # (bh, bw, rh, rw, ci, co)
    return w.reshape(16 * cin, cout)


def _subpixel_deconv_weight(w_t):
    """PyTorch ConvTranspose2d weight (Cin, Cout, 4, 4), stride 2, pad 1 ->
    matmul weight (2*2*Cin, 4*Cout); output-channel order (r, s, cout)."""
    cin, cout = w_t.shape[0], w_t.shape[1]
    taps = ((3, 1), (2, 0))   # kernel taps feeding output sub-pixel r=0 / r=1
    blocks = []
    for r in range(2):
        for s in range(2):
            sub = jnp.stack(
                [
                    jnp.stack(
                        [w_t[:, :, taps[r][th], taps[s][tw]] for tw in range(2)],
                        axis=0,
                    )
                    for th in range(2)
                ],
                axis=0,
            )                                          # (th, tw, cin, cout)
            blocks.append(sub.reshape(4 * cin, cout))
    return jnp.concatenate(blocks, axis=1)             # (4*cin, 4*cout)


def init_params(key, z_dim, nc, spatial):
    ks = jax.random.split(key, 6)
    s4 = spatial // 4
    feat = 32 * s4 * s4
    scale = 0.05
    bf = jnp.bfloat16

    enc_conv1_w = jax.random.normal(ks[0], (16, nc, 4, 4)) * scale
    enc_conv2_w = jax.random.normal(ks[1], (32, 16, 4, 4)) * scale
    enc_fc_w = jax.random.normal(ks[2], (z_dim, feat)) * scale       # (out, in)
    dec_fc_w = jax.random.normal(ks[3], (feat, z_dim)) * scale       # (out, in)
    dec_deconv1_w = jax.random.normal(ks[4], (32, 16, 4, 4)) * scale  # (Cin,Cout,k,k)
    dec_deconv2_w = jax.random.normal(ks[5], (16, nc, 4, 4)) * scale

    return {
        # Weights stored in matmul layout, bf16 (MXU inputs); biases f32.
        "enc_conv1_w": _s2d_conv_weight(enc_conv1_w).astype(bf),
        "enc_conv1_b": jnp.zeros((16,), jnp.float32),
        "enc_conv2_w": _s2d_conv_weight(enc_conv2_w).astype(bf),
        "enc_conv2_b": jnp.zeros((32,), jnp.float32),
        "enc_fc_w": enc_fc_w.T.astype(bf),            # (feat, z_dim)
        "enc_fc_b": jnp.zeros((z_dim,), jnp.float32),
        "dec_fc_w": dec_fc_w.T.astype(bf),            # (z_dim, feat)
        "dec_fc_b": jnp.zeros((feat,), jnp.float32),
        "dec_deconv1_w": _subpixel_deconv_weight(dec_deconv1_w).astype(bf),
        "dec_deconv1_b": jnp.tile(jnp.zeros((16,), jnp.float32), 4),
        "dec_deconv2_w": _subpixel_deconv_weight(dec_deconv2_w).astype(bf),
        "dec_deconv2_b": jnp.tile(jnp.zeros((nc,), jnp.float32), 4),
    }


# ----------------------------------------------------------------------------
# VarianceConstrainedAE forward
# ----------------------------------------------------------------------------
def variance_constrained_ae_forward(
    x_nchw, params, noise_key, *, z_dim, l_lambda=0.1, mu=0.0, sigma=0.05,
    is_nf=False, run_encoder=True,
):
    B, nc, H, W = x_nchw.shape
    bf = jnp.bfloat16

    # --- encoder (VanillaVAEEncoder, assumed arch) ---
    # Per the reference module, the bottleneck only uses the encoder output's
    # SHAPE, never its values: the encoder is dead compute for the returned
    # tensors and can be skipped with run_encoder=False.
    if run_encoder:
        x = jnp.transpose(x_nchw, (0, 2, 3, 1)).astype(bf)   # NCHW -> NHWC
        h = conv2d_s2d(x, params["enc_conv1_w"], params["enc_conv1_b"],
                       pad=1, act="relu", out_dtype=bf)
        h = conv2d_s2d(h, params["enc_conv2_w"], params["enc_conv2_b"],
                       pad=1, act="relu", out_dtype=bf)
        h = h.reshape(B, -1)
        enc_out = matmul_bias_act(h, params["enc_fc_w"], params["enc_fc_b"],
                                  act=None, out_dtype=jnp.float32)   # (B, z_dim)
        noise_shape = enc_out.shape[:2]
    else:
        noise_shape = (B, z_dim)

    # --- bottleneck: z = randn(enc_out.shape[:2]) * sigma + mu ---
    # Tiny (B, z_dim) elementwise op: a dedicated pallas_call would be pure
    # launch overhead (perf review), so it is computed inline.
    noise = jax.random.normal(noise_key, noise_shape, dtype=jnp.float32)
    z = noise * sigma + mu

    if is_nf:
        return z

    # --- decoder (VanillaVAEDecoder, assumed arch) ---
    s4 = H // 4
    d = matmul_bias_act(z, params["dec_fc_w"], params["dec_fc_b"],
                        act="relu", out_dtype=bf)
    d = d.reshape(B, s4, s4, 32)
    d = deconv2d_subpixel(d, params["dec_deconv1_w"], params["dec_deconv1_b"],
                          act="relu", out_dtype=bf)
    d = deconv2d_subpixel(d, params["dec_deconv2_w"], params["dec_deconv2_b"],
                          act="sigmoid", out_dtype=jnp.float32)
    x_rec = jnp.transpose(d, (0, 3, 1, 2))   # NHWC -> NCHW
    return (x_rec, z, l_lambda, z_dim)


# ----------------------------------------------------------------------------
if __name__ == "__main__":
    B, NC, SPATIAL, Z_DIM = 2, 4, 16, 32
    TARGET_SIZE = SPATIAL

    key = jax.random.PRNGKey(0)
    k_params, k_input, k_noise = jax.random.split(key, 3)

    params = init_params(k_params, Z_DIM, NC, SPATIAL)
    x = jax.random.normal(k_input, (B, NC, SPATIAL, SPATIAL), dtype=jnp.float32)

    x_rec, z, l_lambda, v = variance_constrained_ae_forward(
        x, params, k_noise, z_dim=Z_DIM, l_lambda=0.1
    )
    jax.block_until_ready((x_rec, z))

    assert x_rec.shape == (B, NC, TARGET_SIZE, TARGET_SIZE), x_rec.shape
    assert z.shape == (B, Z_DIM), z.shape
    assert l_lambda == 0.1 and v == Z_DIM
    assert bool(jnp.all(jnp.isfinite(x_rec))) and bool(jnp.all(jnp.isfinite(z)))

    print("KERNEL_OK")
</pallas_src>

<mosaic_0001>
module attributes {stable_mosaic.version = 11 : i64} {
  func.func @_mm_bias_act_kernel(%arg0: i32, %arg1: i32, %arg2: i32, %arg3: memref<128x64xbf16, #tpu.memory_space<vmem>>, %arg4: memref<64x16xbf16, #tpu.memory_space<vmem>>, %arg5: memref<1x16xf32, #tpu.memory_space<vmem>>, %arg6: memref<128x16xbf16, #tpu.memory_space<vmem>>, %arg7: memref<128x16xf32, #tpu.memory_space<vmem>>) attributes {dimension_semantics = [#tpu.dimension_semantics<parallel>, #tpu.dimension_semantics<parallel>, #tpu.dimension_semantics<arbitrary>], iteration_bounds = array<i64: 1, 1, 1>, scalar_prefetch = 0 : i64, scratch_operands = 1 : i64, tpu.core_type = #tpu.core_type<tc>, window_params = [{transform_indices = @transform_0, window_bounds = array<i64: 128, 64>}, {transform_indices = @transform_1, window_bounds = array<i64: 64, 16>}, {transform_indices = @transform_2, window_bounds = array<i64: 1, 16>}, {transform_indices = @transform_3, window_bounds = array<i64: 128, 16>}]} {
    %c0_i32 = arith.constant 0 : i32
    %0 = arith.cmpi eq, %arg2, %c0_i32 : i32
    %1 = arith.extui %0 : i1 to i32
    %c0_i32_0 = arith.constant 0 : i32
    %2 = arith.cmpi ne, %1, %c0_i32_0 : i32
    scf.if %2 {
      %cst_10 = arith.constant 0.000000e+00 : f32
      %12 = vector.broadcast %cst_10 : f32 to vector<128x16xf32>
      %c0_11 = arith.constant 0 : index
      %c0_12 = arith.constant 0 : index
      %13 = vector.load %arg7[%c0_11, %c0_12] : memref<128x16xf32, #tpu.memory_space<vmem>>, vector<128x16xf32>
      tpu.vector_store %arg7[%c0_11, %c0_12], %12 {strides = array<i32>} : memref<128x16xf32, #tpu.memory_space<vmem>>, vector<128x16xf32>,
    } else {
    }
    %c0 = arith.constant 0 : index
    %c0_1 = arith.constant 0 : index
    %3 = vector.load %arg7[%c0, %c0_1] : memref<128x16xf32, #tpu.memory_space<vmem>>, vector<128x16xf32>
    %c0_2 = arith.constant 0 : index
    %c0_3 = arith.constant 0 : index
    %4 = vector.load %arg3[%c0_2, %c0_3] : memref<128x64xbf16, #tpu.memory_space<vmem>>, vector<128x64xbf16>
    %c0_4 = arith.constant 0 : index
    %c0_5 = arith.constant 0 : index
    %5 = vector.load %arg4[%c0_4, %c0_5] : memref<64x16xbf16, #tpu.memory_space<vmem>>, vector<64x16xbf16>
    %cst = arith.constant dense<0.000000e+00> : vector<128x16xf32>
    %6 = tpu.matmul %4, %5, %cst {dimension_numbers = #tpu.dot_dimension_numbers<[1], [0], [0], [1], [0, 0, 1, 1], [], []>} : vector<128x64xbf16>, vector<64x16xbf16>, vector<128x16xf32> -> vector<128x16xf32>
    %7 = arith.addf %3, %6 : vector<128x16xf32>
    %c0_6 = arith.constant 0 : index
    %c0_7 = arith.constant 0 : index
    %8 = vector.load %arg7[%c0_6, %c0_7] : memref<128x16xf32, #tpu.memory_space<vmem>>, vector<128x16xf32>
    tpu.vector_store %arg7[%c0_6, %c0_7], %7 {strides = array<i32>} : memref<128x16xf32, #tpu.memory_space<vmem>>, vector<128x16xf32>,
    %c0_i32_8 = arith.constant 0 : i32
    %9 = arith.cmpi eq, %arg2, %c0_i32_8 : i32
    %10 = arith.extui %9 : i1 to i32
    %c0_i32_9 = arith.constant 0 : i32
    %11 = arith.cmpi ne, %10, %c0_i32_9 : i32
    scf.if %11 {
      %c0_10 = arith.constant 0 : index
      %c0_11 = arith.constant 0 : index
      %12 = vector.load %arg7[%c0_10, %c0_11] : memref<128x16xf32, #tpu.memory_space<vmem>>, vector<128x16xf32>
      %c0_12 = arith.constant 0 : index
      %c0_13 = arith.constant 0 : index
      %13 = vector.load %arg5[%c0_12, %c0_13] : memref<1x16xf32, #tpu.memory_space<vmem>>, vector<1x16xf32>
      %14 = vector.broadcast %13 : vector<1x16xf32> to vector<128x16xf32>
      %15 = arith.addf %12, %14 : vector<128x16xf32>
      %cst_14 = arith.constant 0.000000e+00 : f32
      %16 = vector.broadcast %cst_14 : f32 to vector<128x16xf32>
      %17 = arith.maximumf %15, %16 : vector<128x16xf32>
      %18 = arith.truncf %17 : vector<128x16xf32> to vector<128x16xbf16>
      %c0_15 = arith.constant 0 : index
      %c0_16 = arith.constant 0 : index
      %19 = vector.load %arg6[%c0_15, %c0_16] : memref<128x16xbf16, #tpu.memory_space<vmem>>, vector<128x16xbf16>
      tpu.vector_store %arg6[%c0_15, %c0_16], %18 {strides = array<i32>} : memref<128x16xbf16, #tpu.memory_space<vmem>>, vector<128x16xbf16>,
    } else {
    }
    return
  }
  func.func @transform_0(%arg0: i32, %arg1: i32, %arg2: i32) -> (i32, i32) {
    %c0_i32 = arith.constant 0 : i32
    return %arg0, %arg2 : i32, i32
  }
  func.func @transform_1(%arg0: i32, %arg1: i32, %arg2: i32) -> (i32, i32) {
    %c0_i32 = arith.constant 0 : i32
    return %arg2, %arg1 : i32, i32
  }
  func.func @transform_2(%arg0: i32, %arg1: i32, %arg2: i32) -> (i32, i32) {
    %c0_i32 = arith.constant 0 : i32
    %c0_i32_0 = arith.constant 0 : i32
    return %c0_i32, %arg1 : i32, i32
  }
  func.func @transform_3(%arg0: i32, %arg1: i32, %arg2: i32) -> (i32, i32) {
    %c0_i32 = arith.constant 0 : i32
    return %arg0, %arg1 : i32, i32
  }
}

</mosaic_0001>

<bundles_post_ra>
// kernel: tpu_custom_call.1
= control target key start
LH: loop header
LB: loop body
LE: loop exit
PB: predicated region body
PF: predicated region fallthrough
CT: control target
= control target key end

     0   :  { %vm19_vm0 = vcmask 130048   ;;  %v548_v1 = vmov 0.0   ;;  %vm140_vm1 = vcmask 523264   ;;  %vm417_vm2 = vcmask 125952   ;;  %s730_s1 = inlined_call_operand.vmem [shape: bf16[64,16], index: 1, kind: input, shape index: {}]   ;;  %s731_s0 = inlined_call_operand.vmem [shape: bf16[128,64], index: 0, kind: input, shape index: {}]   ;;  %s732_s2 = inlined_call_operand.vmem [shape: f32[1,16], index: 2, kind: input, shape index: {}]   ;;  %s733_s3 = inlined_call_operand.vmem [shape: bf16[128,16], index: 3, kind: output, shape index: {}]  }
   0x1   :  { %v536_v0 = vld [vmem:[%s730_s1] sm:$0xff]   ;;  %22 = vst.msk [vmem:[#allocation2 + $0x10] sm:$0xff] %vm19_vm0, %v548_v1  ;;  %20 = vst.msk [vmem:[#allocation2] sm:$0xff] %vm19_vm0, %v548_v1  ;;  %v537_v2 = vld [vmem:[%s730_s1 + $0x8] sm:$0xff]  }
   0x2   :  { %21 = vst.msk [vmem:[#allocation2 + $0x8] sm:$0xff] %vm19_vm0, %v548_v1  ;;  %23 = vst.msk [vmem:[#allocation2 + $0x18] sm:$0xff] %vm19_vm0, %v548_v1  ;;  %503 = vmatprep.subr.bf16.mxu0 %v536_v0  ;;  %527 = vmatprep.subr.bf16.mxu1 %v536_v0  ;;  %v538_v3 = vld [vmem:[%s730_s1 + $0x10] sm:$0xff]   ;;  %v540_v4 = vld [vmem:[%s731_s0] sm:$0xff]  }
   0x3   :  { %24 = vst.msk [vmem:[#allocation2 + $0x20] sm:$0xff] %vm19_vm0, %v548_v1  ;;  %25 = vst.msk [vmem:[#allocation2 + $0x28] sm:$0xff] %vm19_vm0, %v548_v1  ;;  %504 = vmatpush3.bf16.msra.mxu0 %v536_v0  ;;  %531 = vmatpush3.bf16.msra.mxu1 %v536_v0  ;;  %v541_v5 = vld [vmem:[%s731_s0 + $0x20] sm:$0xff]   ;;  %v539_v6 = vld [vmem:[%s730_s1 + $0x18] sm:$0xff]  }
   0x4   :  { %26 = vst.msk [vmem:[#allocation2 + $0x30] sm:$0xff] %vm19_vm0, %v548_v1  ;;  %27 = vst.msk [vmem:[#allocation2 + $0x38] sm:$0xff] %vm19_vm0, %v548_v1  ;;  %505 = vmatprep.subr.bf16.mxu0 %v537_v2  ;;  %528 = vmatprep.subr.bf16.mxu1 %v537_v2  ;;  %v542_v7 = vld [vmem:[%s731_s0 + $0x8] sm:$0xff]   ;;  %v544_v9 = vld [vmem:[%s731_s0 + $0x10] sm:$0xff]  }
   0x5   :  { %28 = vst.msk [vmem:[#allocation2 + $0x40] sm:$0xff] %vm19_vm0, %v548_v1  ;;  %29 = vst.msk [vmem:[#allocation2 + $0x48] sm:$0xff] %vm19_vm0, %v548_v1  ;;  %511 = vmatprep.mubr.msk.bf16.mxu0 %vm140_vm1, %v540_v4  ;;  %519 = vmatprep.mubr.msk.bf16.mxu1 %vm140_vm1, %v541_v5  ;;  %v543_v8 = vld [vmem:[%s731_s0 + $0x28] sm:$0xff]   ;;  %v545_v10 = vld [vmem:[%s731_s0 + $0x30] sm:$0xff]  }
   0x6   :  { %30 = vst.msk [vmem:[#allocation2 + $0x50] sm:$0xff] %vm19_vm0, %v548_v1  ;;  %31 = vst.msk [vmem:[#allocation2 + $0x58] sm:$0xff] %vm19_vm0, %v548_v1  ;;  %v546_v11 = vld [vmem:[%s731_s0 + $0x18] sm:$0xff]   ;;  %v640_v41 = vld [vmem:[%s732_s2] ss:$0 sm:$0xff] }
   0x7   :  { %32 = vst.msk [vmem:[#allocation2 + $0x60] sm:$0xff] %vm19_vm0, %v548_v1  ;;  %33 = vst.msk [vmem:[#allocation2 + $0x68] sm:$0xff] %vm19_vm0, %v548_v1  ;;  %506 = vmatpush3.bf16.msra.mxu0 %v537_v2  ;;  %532 = vmatpush3.bf16.msra.mxu1 %v537_v2  ;;  %v547_v12 = vld [vmem:[%s731_s0 + $0x38] sm:$0xff]  }
   0x8   :  { %34 = vst.msk [vmem:[#allocation2 + $0x70] sm:$0xff] %vm19_vm0, %v548_v1  ;;  %35 = vst.msk [vmem:[#allocation2 + $0x78] sm:$0xff] %vm19_vm0, %v548_v1  ;;  %507 = vmatprep.subr.bf16.mxu0 %v538_v3  ;;  %529 = vmatprep.subr.bf16.mxu1 %v538_v3  ;;  %v38_v13 = vld [vmem:[#allocation2 + $0x10] sm:$0xff]  ;;  %v36_v15 = vld [vmem:[#allocation2] sm:$0xff] }
   0x9   :  { %v39_v19 = vld [vmem:[#allocation2 + $0x18] sm:$0xff]  ;;  %v37_v25 = vld [vmem:[#allocation2 + $0x8] sm:$0xff] }
   0xa   :  { %v40_v39 = vld [vmem:[#allocation2 + $0x20] sm:$0xff]  ;;  %v41_v50 = vld [vmem:[#allocation2 + $0x28] sm:$0xff] }
   0xb   :  { %508 = vmatpush3.bf16.msra.mxu0 %v538_v3  ;;  %533 = vmatpush3.bf16.msra.mxu1 %v538_v3  ;;  %v42_v37 = vld [vmem:[#allocation2 + $0x30] sm:$0xff]  ;;  %v43_v44 = vld [vmem:[#allocation2 + $0x38] sm:$0xff] }
   0xc   :  { %509 = vmatprep.subr.bf16.mxu0 %v539_v6  ;;  %530 = vmatprep.subr.bf16.mxu1 %v539_v6  ;;  %v44_v16 = vld [vmem:[#allocation2 + $0x40] sm:$0xff]  ;;  %v45_v26 = vld [vmem:[#allocation2 + $0x48] sm:$0xff] }
   0xd   :  { %v46_v14 = vld [vmem:[#allocation2 + $0x50] sm:$0xff]  ;;  %v47_v20 = vld [vmem:[#allocation2 + $0x58] sm:$0xff] }
   0xe   :  { %v48_v40 = vld [vmem:[#allocation2 + $0x60] sm:$0xff]  ;;  %v49_v51 = vld [vmem:[#allocation2 + $0x68] sm:$0xff] }
   0xf   :  { %510 = vmatpush3.bf16.msra.mxu0 %v539_v6  ;;  %534 = vmatpush3.bf16.msra.mxu1 %v539_v6  ;;  %v50_v38 = vld [vmem:[#allocation2 + $0x70] sm:$0xff]  ;;  %v51_v45 = vld [vmem:[#allocation2 + $0x78] sm:$0xff] }
  0x12   :  { %512 = vmatmul.mubr.msk.bf16.vlgmr.msra.gmra.mrb[0].mxu0 %vm140_vm1, %v542_v7  ;;  %520 = vmatmul.mubr.msk.bf16.vlgmr.msra.gmra.mrb[0].mxu1 %vm140_vm1, %v543_v8 }
  0x13   :  { %515 = vmatprep.mubr.msk.bf16.mxu0 %vm140_vm1, %v544_v9  ;;  %523 = vmatprep.mubr.msk.bf16.mxu1 %vm140_vm1, %v545_v10 }
  0x1a   :  { %516 = vmatmul.mubr.msk.bf16.gmra.mrb[4].mxu0 %vm140_vm1, %v546_v11  ;;  %524 = vmatmul.mubr.msk.bf16.gmra.mrb[4].mxu1 %vm140_vm1, %v547_v12 }
  0xe5   :  { %v513_v17 = vpop.f32.mrb[0].mxu0  ;;  %v521_v18 = vpop.f32.mrb[0].mxu1 }
  0xe6   :  { %v264_v21 = vadd.f32 %v513_v17, %v38_v13  ;;  %v272_v22 = vadd.f32 %v521_v18, %v46_v14  ;;  %v199_v23 = vpop.f32.mrb[1].mxu0  ;;  %v231_v24 = vpop.f32.mrb[1].mxu1 }
  0xe7   :  { %v262_v27 = vadd.f32 %v199_v23, %v36_v15  ;;  %v270_v28 = vadd.f32 %v231_v24, %v44_v16  ;;  %v514_v29 = vpop.f32.mrb[2].mxu0  ;;  %v522_v30 = vpop.f32.mrb[2].mxu1 }
  0xe8   :  { %281 = vst.msk [vmem:[#allocation2 + $0x10] sm:$0xff] %vm19_vm0, %v264_v21  ;;  %289 = vst.msk [vmem:[#allocation2 + $0x50] sm:$0xff] %vm19_vm0, %v272_v22  ;;  %v265_v31 = vadd.f32 %v514_v29, %v39_v19  ;;  %v273_v32 = vadd.f32 %v522_v30, %v47_v20  ;;  %v202_v33 = vpop.f32.mrb[3].mxu0  ;;  %v234_v34 = vpop.f32.mrb[3].mxu1 }
  0xe9   :  { %279 = vst.msk [vmem:[#allocation2] sm:$0xff] %vm19_vm0, %v262_v27  ;;  %287 = vst.msk [vmem:[#allocation2 + $0x40] sm:$0xff] %vm19_vm0, %v270_v28  ;;  %v263_v35 = vadd.f32 %v202_v33, %v37_v25  ;;  %v271_v36 = vadd.f32 %v234_v34, %v45_v26 }
  0xea   :  { %282 = vst.msk [vmem:[#allocation2 + $0x18] sm:$0xff] %vm19_vm0, %v265_v31  ;;  %290 = vst.msk [vmem:[#allocation2 + $0x58] sm:$0xff] %vm19_vm0, %v273_v32 }
  0xeb   :  { %280 = vst.msk [vmem:[#allocation2 + $0x8] sm:$0xff] %vm19_vm0, %v263_v35  ;;  %288 = vst.msk [vmem:[#allocation2 + $0x48] sm:$0xff] %vm19_vm0, %v271_v36 }
  0xed   :  { %v517_v42 = vpop.f32.mrb[4].mxu0  ;;  %v525_v43 = vpop.f32.mrb[4].mxu1 }
  0xee   :  { %v268_v46 = vadd.f32 %v517_v42, %v42_v37  ;;  %v276_v47 = vadd.f32 %v525_v43, %v50_v38  ;;  %v215_v48 = vpop.f32.mrb[5].mxu0  ;;  %v247_v49 = vpop.f32.mrb[5].mxu1 }
  0xef   :  { %v300_v52 = vld [vmem:[#allocation2 + $0x10] sm:$0xff]  ;;  %v266_v54 = vadd.f32 %v215_v48, %v40_v39  ;;  %v274_v55 = vadd.f32 %v247_v49, %v48_v40  ;;  %v518_v56 = vpop.f32.mrb[6].mxu0  ;;  %v526_v57 = vpop.f32.mrb[6].mxu1 }
  0xf0   :  { %v308_v53 = vld [vmem:[#allocation2 + $0x50] sm:$0xff]  ;;  %v323_v58 = vadd.f32 %v640_v41, %v300_v52  ;;  %v298_v60 = vld [vmem:[#allocation2] sm:$0xff]  ;;  %285 = vst.msk [vmem:[#allocation2 + $0x30] sm:$0xff] %vm19_vm0, %v268_v46  ;;  %293 = vst.msk [vmem:[#allocation2 + $0x70] sm:$0xff] %vm19_vm0, %v276_v47  ;;  %v269_v62 = vadd.f32 %v518_v56, %v43_v44  ;;  %v277_v63 = vadd.f32 %v526_v57, %v51_v45  ;;  %v218_v0 = vpop.f32.mrb[7].mxu0  ;;  %v250_v1 = vpop.f32.mrb[7].mxu1 }
  0xf1   :  { %v331_v59 = vadd.f32 %v640_v41, %v308_v53  ;;  %v306_v61 = vld [vmem:[#allocation2 + $0x40] sm:$0xff]  ;;  %v321_v2 = vadd.f32 %v640_v41, %v298_v60  ;;  %v301_v4 = vld [vmem:[#allocation2 + $0x18] sm:$0xff]  ;;  %283 = vst.msk [vmem:[#allocation2 + $0x20] sm:$0xff] %vm19_vm0, %v266_v54  ;;  %291 = vst.msk [vmem:[#allocation2 + $0x60] sm:$0xff] %vm19_vm0, %v274_v55  ;;  %v267_v6 = vadd.f32 %v218_v0, %v41_v50 }
  0xf2   :  { %v329_v3 = vadd.f32 %v640_v41, %v306_v61  ;;  %v309_v5 = vld [vmem:[#allocation2 + $0x58] sm:$0xff]  ;;  %v275_v7 = vadd.f32 %v250_v1, %v49_v51  ;;  %v339_v8 = vmax.f32 %v323_v58, 0.0  ;;  %v324_v10 = vadd.f32 %v640_v41, %v301_v4  ;;  %v299_v12 = vld [vmem:[#allocation2 + $0x8] sm:$0xff]  ;;  %286 = vst.msk [vmem:[#allocation2 + $0x38] sm:$0xff] %vm19_vm0, %v269_v62  ;;  %294 = vst.msk [vmem:[#allocation2 + $0x78] sm:$0xff] %vm19_vm0, %v277_v63 }
  0xf3   :  { %v347_v9 = vmax.f32 %v331_v59, 0.0  ;;  %v332_v11 = vadd.f32 %v640_v41, %v309_v5  ;;  %v307_v13 = vld [vmem:[#allocation2 + $0x48] sm:$0xff]  ;;  %v337_v14 = vmax.f32 %v321_v2, 0.0  ;;  %v322_v16 = vadd.f32 %v640_v41, %v299_v12  ;;  %284 = vst.msk [vmem:[#allocation2 + $0x28] sm:$0xff] %vm19_vm0, %v267_v6 }
  0xf4   :  { %v345_v15 = vmax.f32 %v329_v3, 0.0  ;;  %v330_v17 = vadd.f32 %v640_v41, %v307_v13  ;;  %292 = vst.msk [vmem:[#allocation2 + $0x68] sm:$0xff] %vm19_vm0, %v275_v7  ;;  %v477_v18 = vpack.c.bf16 %v339_v8, %v339_v8  ;;  %v340_v20 = vmax.f32 %v324_v10, 0.0 }
  0xf5   :  { %v485_v19 = vpack.c.bf16 %v347_v9, %v347_v9  ;;  %v348_v21 = vmax.f32 %v332_v11, 0.0  ;;  %v475_v22 = vpack.c.bf16 %v337_v14, %v337_v14  ;;  %v338_v24 = vmax.f32 %v322_v16, 0.0 }
  0xf6   :  { %v483_v23 = vpack.c.bf16 %v345_v15, %v345_v15  ;;  %v346_v25 = vmax.f32 %v330_v17, 0.0  ;;  %420 = vst.msk [vmem:[%s733_s3 + $0x8] sm:$0xf] %vm417_vm2, %v477_v18  ;;  %v478_v26 = vpack.c.bf16 %v340_v20, %v340_v20 }
  0xf7   :  { %428 = vst.msk [vmem:[%s733_s3 + $0x28] sm:$0xf] %vm417_vm2, %v485_v19  ;;  %v486_v27 = vpack.c.bf16 %v348_v21, %v348_v21  ;;  %418 = vst.msk [vmem:[%s733_s3] sm:$0xf] %vm417_vm2, %v475_v22  ;;  %v476_v28 = vpack.c.bf16 %v338_v24, %v338_v24  ;;  %v304_v30 = vld [vmem:[#allocation2 + $0x30] sm:$0xff] }
  0xf8   :  { %426 = vst.msk [vmem:[%s733_s3 + $0x20] sm:$0xf] %vm417_vm2, %v483_v23  ;;  %v484_v29 = vpack.c.bf16 %v346_v25, %v346_v25  ;;  %v312_v31 = vld [vmem:[#allocation2 + $0x70] sm:$0xff]  ;;  %421 = vst.msk [vmem:[%s733_s3 + $0xc] sm:$0xf] %vm417_vm2, %v478_v26  ;;  %v327_v32 = vadd.f32 %v640_v41, %v304_v30  ;;  %v302_v34 = vld [vmem:[#allocation2 + $0x20] sm:$0xff] }
  0xf9   :  { %429 = vst.msk [vmem:[%s733_s3 + $0x2c] sm:$0xf] %vm417_vm2, %v486_v27  ;;  %v335_v33 = vadd.f32 %v640_v41, %v312_v31  ;;  %v310_v35 = vld [vmem:[#allocation2 + $0x60] sm:$0xff]  ;;  %419 = vst.msk [vmem:[%s733_s3 + $0x4] sm:$0xf] %vm417_vm2, %v476_v28  ;;  %v325_v36 = vadd.f32 %v640_v41, %v302_v34  ;;  %v305_v38 = vld [vmem:[#allocation2 + $0x38] sm:$0xff] }
  0xfa   :  { %427 = vst.msk [vmem:[%s733_s3 + $0x24] sm:$0xf] %vm417_vm2, %v484_v29  ;;  %v333_v37 = vadd.f32 %v640_v41, %v310_v35  ;;  %v313_v39 = vld [vmem:[#allocation2 + $0x78] sm:$0xff]  ;;  %v343_v40 = vmax.f32 %v327_v32, 0.0  ;;  %v328_v43 = vadd.f32 %v640_v41, %v305_v38  ;;  %v303_v45 = vld [vmem:[#allocation2 + $0x28] sm:$0xff] }
  0xfb   :  { %v351_v42 = vmax.f32 %v335_v33, 0.0  ;;  %v336_v44 = vadd.f32 %v640_v41, %v313_v39  ;;  %v311_v46 = vld [vmem:[#allocation2 + $0x68] sm:$0xff]  ;;  %v341_v47 = vmax.f32 %v325_v36, 0.0  ;;  %v326_v49 = vadd.f32 %v640_v41, %v303_v45 }
  0xfc   :  { %v349_v48 = vmax.f32 %v333_v37, 0.0  ;;  %v334_v50 = vadd.f32 %v640_v41, %v311_v46  ;;  %v481_v51 = vpack.c.bf16 %v343_v40, %v343_v40  ;;  %v344_v53 = vmax.f32 %v328_v43, 0.0 }
  0xfd   :  { %v489_v52 = vpack.c.bf16 %v351_v42, %v351_v42  ;;  %v352_v54 = vmax.f32 %v336_v44, 0.0  ;;  %v479_v55 = vpack.c.bf16 %v341_v47, %v341_v47  ;;  %v342_v57 = vmax.f32 %v326_v49, 0.0 }
  0xfe   :  { %v487_v56 = vpack.c.bf16 %v349_v48, %v349_v48  ;;  %v350_v58 = vmax.f32 %v334_v50, 0.0  ;;  %424 = vst.msk [vmem:[%s733_s3 + $0x18] sm:$0xf] %vm417_vm2, %v481_v51  ;;  %v482_v59 = vpack.c.bf16 %v344_v53, %v344_v53 }
  0xff   :  { %432 = vst.msk [vmem:[%s733_s3 + $0x38] sm:$0xf] %vm417_vm2, %v489_v52  ;;  %v490_v41 = vpack.c.bf16 %v352_v54, %v352_v54  ;;  %422 = vst.msk [vmem:[%s733_s3 + $0x10] sm:$0xf] %vm417_vm2, %v479_v55  ;;  %v480_v60 = vpack.c.bf16 %v342_v57, %v342_v57 }
 0x100   :  { %430 = vst.msk [vmem:[%s733_s3 + $0x30] sm:$0xf] %vm417_vm2, %v487_v56  ;;  %v488_v61 = vpack.c.bf16 %v350_v58, %v350_v58  ;;  %425 = vst.msk [vmem:[%s733_s3 + $0x1c] sm:$0xf] %vm417_vm2, %v482_v59 }
 0x101   :  { %433 = vst.msk [vmem:[%s733_s3 + $0x3c] sm:$0xf] %vm417_vm2, %v490_v41  ;;  %423 = vst.msk [vmem:[%s733_s3 + $0x14] sm:$0xf] %vm417_vm2, %v480_v60 }
 0x102   :  { %431 = vst.msk [vmem:[%s733_s3 + $0x34] sm:$0xf] %vm417_vm2, %v488_v61 }

</bundles_post_ra>
